<compile_context>
chip_gen: v6e
topology: v6e:2x2x1
jax: 0.10.0
libtpu: 0.0.40
codegen_flags: <defaults>
</compile_context>

<pallas_src>
import jax
import jax.numpy as jnp
from jax.experimental import pallas as pl
from jax.experimental.pallas import tpu as pltpu

NUM_FEATURES = 7
HIDDEN_SIZE = 64 * 3          # 192
HIDDEN_2 = HIDDEN_SIZE // 2   # 96
OUTPUT_SIZE = 1
K_AUG = NUM_FEATURES + 1      # 8: features + constant-1 bias row (sublane aligned)


def _round_up(n, m):
    return ((n + m - 1) // m) * m


def _cdiv(a, b):
    return (a + b - 1) // b


def mlp_kernel(x_ref, w1_ref, w2_ref, b2_ref, w3_ref, b3_ref, o_ref):
    # Batch on the lane axis everywhere:
    #   x tile            : (8,   bm)  (7 features + constant-1 row, bf16/f32)
    #   h1 = W1aug @ x    : (192, bm)  layer-1 bias folded into W1aug
    #   h2 = W2 @ h1 + b2 : (96,  bm)
    #   o  = w3 . h2 + b3 : (1,   bm)  VPU multiply + sublane reduce, lane-dense
    x = x_ref[...]

    h1 = jnp.dot(w1_ref[...], x, preferred_element_type=jnp.float32)   # (192, bm)
    h1 = jnp.maximum(h1, 0.0)

    h2 = jnp.dot(w2_ref[...], h1.astype(w2_ref.dtype),
                 preferred_element_type=jnp.float32)                   # (96, bm)
    h2 = jnp.maximum(h2 + b2_ref[...], 0.0)

    o = jnp.sum(h2 * w3_ref[...], axis=0, keepdims=True)               # (1, bm)
    o_ref[...] = (o + b3_ref[...]).astype(o_ref.dtype)


def mlp_forward(x, params, *, bm=2048, use_bf16=True):
    """x: (B, NUM_FEATURES) float32 -> (B, OUTPUT_SIZE) float32."""
    B = x.shape[0]
    compute_dtype = jnp.bfloat16 if use_bf16 else jnp.float32

    # ---- tile sizing: lane-dense tiles, >=2 steps when possible (v7x 2 TCs) --
    bm = _round_up(bm, 128)
    B_pad = _round_up(max(B, 1), 128)
    n_steps = max(2, _cdiv(B_pad, bm)) if B_pad > 128 else 1
    bm_eff = _round_up(_cdiv(B_pad, n_steps), 128)
    B_pad = _round_up(B_pad, bm_eff)
    grid = (B_pad // bm_eff,)

    # ---- operand prep (layout plumbing, once per call, outside the kernel) --
    # x^T augmented with a constant-1 row: folds the layer-1 bias into the MXU.
    ones = jnp.ones((B, 1), x.dtype)
    x_aug_t = jnp.concatenate([x, ones], axis=1).T                     # (8, B)
    x_aug_t = jnp.pad(x_aug_t, ((0, 0), (0, B_pad - B)))               # (8, B_pad)
    x_aug_t = x_aug_t.astype(compute_dtype)                            # cast once

    w1_aug_t = jnp.concatenate(
        [params["w1"].T, params["b1"].reshape(HIDDEN_SIZE, 1)], axis=1
    ).astype(compute_dtype)                                            # (192, 8)
    w2_t = params["w2"].T.astype(compute_dtype)                        # (96, 192)
    b2_col = params["b2"].reshape(HIDDEN_2, 1)                         # (96, 1) f32
    w3_col = params["w3"].reshape(HIDDEN_2, 1)                         # (96, 1) f32
    b3 = params["b3"].reshape(1, 1)                                    # (1, 1)  f32

    # Full-array blocks with constant index_maps -> weights stay VMEM-resident.
    full = lambda a: pl.BlockSpec(a.shape, lambda i: (0, 0))

    flops = 2 * B_pad * (K_AUG * HIDDEN_SIZE + HIDDEN_SIZE * HIDDEN_2 + HIDDEN_2)
    bytes_accessed = (
        B_pad * (K_AUG * x_aug_t.dtype.itemsize + 4)
        + w1_aug_t.size * w1_aug_t.dtype.itemsize
        + w2_t.size * w2_t.dtype.itemsize
        + 4 * (b2_col.size + w3_col.size + b3.size)
    )

    out = pl.pallas_call(
        mlp_kernel,
        out_shape=jax.ShapeDtypeStruct((1, B_pad), jnp.float32),
        grid=grid,
        in_specs=[
            pl.BlockSpec((K_AUG, bm_eff), lambda i: (0, i)),           # x^T tile
            full(w1_aug_t),
            full(w2_t),
            full(b2_col),
            full(w3_col),
            full(b3),
        ],
        out_specs=pl.BlockSpec((1, bm_eff), lambda i: (0, i)),         # lane-dense
        compiler_params=pltpu.CompilerParams(
            dimension_semantics=("parallel",)),
        cost_estimate=pl.CostEstimate(
            flops=flops, transcendentals=0, bytes_accessed=bytes_accessed),
    )(x_aug_t, w1_aug_t, w2_t, b2_col, w3_col, b3)

    # (1, B_pad) lane-dense row -> PyTorch-shaped (B, 1); padded rows sliced off.
    return out.reshape(B_pad, 1)[:B]


def init_params(key):
    """Deterministic init matching nn.Linear shapes (weights stored transposed)."""
    ks = jax.random.split(key, 6)

    def uniform_init(k, shape, fan_in):
        bound = 1.0 / jnp.sqrt(fan_in)
        return jax.random.uniform(k, shape, jnp.float32, -bound, bound)

    return {
        # nn.Linear(7, 192): weight (192, 7) -> stored as (7, 192)
        "w1": uniform_init(ks[0], (NUM_FEATURES, HIDDEN_SIZE), NUM_FEATURES),
        "b1": uniform_init(ks[1], (1, HIDDEN_SIZE), NUM_FEATURES),
        # nn.Linear(192, 96): stored as (192, 96)
        "w2": uniform_init(ks[2], (HIDDEN_SIZE, HIDDEN_2), HIDDEN_SIZE),
        "b2": uniform_init(ks[3], (1, HIDDEN_2), HIDDEN_SIZE),
        # nn.Linear(96, 1): stored as (96, 1)
        "w3": uniform_init(ks[4], (HIDDEN_2, OUTPUT_SIZE), HIDDEN_2),
        "b3": uniform_init(ks[5], (1, OUTPUT_SIZE), HIDDEN_2),
    }


def reference_forward(x, p):
    h1 = jnp.maximum(x @ p["w1"] + p["b1"], 0.0)
    h2 = jnp.maximum(h1 @ p["w2"] + p["b2"], 0.0)
    return h2 @ p["w3"] + p["b3"]


if __name__ == "__main__":
    key = jax.random.PRNGKey(0)
    k_x, k_p = jax.random.split(key)

    B = 10  # small, deliberately not a multiple of 8/128 to exercise padding
    x = jax.random.normal(k_x, (B, NUM_FEATURES), jnp.float32)
    params = init_params(k_p)

    ref = reference_forward(x, params)

    # f32 path: tight check against the JAX reference.
    out_f32 = jax.block_until_ready(mlp_forward(x, params, use_bf16=False))
    assert out_f32.shape == (B, OUTPUT_SIZE)
    assert jnp.allclose(out_f32, ref, atol=1e-3, rtol=1e-3), "f32 mismatch vs reference"

    # Default optimized path: bf16 matmul operands, f32 accumulation.
    # Note: inputs/activations are cast to bf16 before the MXU (documented
    # precision trade-off); the looser tolerance covers the mantissa loss.
    out = jax.block_until_ready(mlp_forward(x, params))
    assert out.shape == (B, OUTPUT_SIZE)
    assert jnp.allclose(out, ref, atol=5e-2, rtol=5e-2), "bf16 mismatch vs reference"

    print("KERNEL_OK")
</pallas_src>

<mosaic_0001>
module attributes {stable_mosaic.version = 11 : i64} {
  func.func @mlp_kernel(%arg0: i32, %arg1: memref<8x128xf32, #tpu.memory_space<vmem>>, %arg2: memref<192x8xf32, #tpu.memory_space<vmem>>, %arg3: memref<96x192xf32, #tpu.memory_space<vmem>>, %arg4: memref<96x1xf32, #tpu.memory_space<vmem>>, %arg5: memref<96x1xf32, #tpu.memory_space<vmem>>, %arg6: memref<1x1xf32, #tpu.memory_space<vmem>>, %arg7: memref<1x128xf32, #tpu.memory_space<vmem>>) attributes {dimension_semantics = [#tpu.dimension_semantics<parallel>], iteration_bounds = array<i64: 1>, scalar_prefetch = 0 : i64, scratch_operands = 0 : i64, tpu.core_type = #tpu.core_type<tc>, window_params = [{transform_indices = @transform_0, window_bounds = array<i64: 8, 128>}, {pipeline_mode = #tpu.pipeline_mode<synchronous>, transform_indices = @transform_1, window_bounds = array<i64: 192, 8>}, {pipeline_mode = #tpu.pipeline_mode<synchronous>, transform_indices = @transform_2, window_bounds = array<i64: 96, 192>}, {pipeline_mode = #tpu.pipeline_mode<synchronous>, transform_indices = @transform_3, window_bounds = array<i64: 96, 1>}, {pipeline_mode = #tpu.pipeline_mode<synchronous>, transform_indices = @transform_4, window_bounds = array<i64: 96, 1>}, {pipeline_mode = #tpu.pipeline_mode<synchronous>, transform_indices = @transform_5, window_bounds = array<i64: 1, 1>}, {transform_indices = @transform_6, window_bounds = array<i64: 1, 128>}]} {
    %c0 = arith.constant 0 : index
    %c0_0 = arith.constant 0 : index
    %0 = vector.load %arg1[%c0, %c0_0] : memref<8x128xf32, #tpu.memory_space<vmem>>, vector<8x128xf32>
    %c0_1 = arith.constant 0 : index
    %c0_2 = arith.constant 0 : index
    %1 = vector.load %arg2[%c0_1, %c0_2] : memref<192x8xf32, #tpu.memory_space<vmem>>, vector<192x8xf32>
    %cst = arith.constant dense<0.000000e+00> : vector<192x128xf32>
    %2 = tpu.matmul %1, %0, %cst {dimension_numbers = #tpu.dot_dimension_numbers<[1], [0], [0], [1], [0, 0, 1, 1], [], []>} : vector<192x8xf32>, vector<8x128xf32>, vector<192x128xf32> -> vector<192x128xf32>
    %cst_3 = arith.constant 0.000000e+00 : f32
    %3 = vector.broadcast %cst_3 : f32 to vector<192x128xf32>
    %4 = arith.maximumf %2, %3 : vector<192x128xf32>
    %c0_4 = arith.constant 0 : index
    %c0_5 = arith.constant 0 : index
    %5 = vector.load %arg3[%c0_4, %c0_5] : memref<96x192xf32, #tpu.memory_space<vmem>>, vector<96x192xf32>
    %cst_6 = arith.constant dense<0.000000e+00> : vector<96x128xf32>
    %6 = tpu.matmul %5, %4, %cst_6 {dimension_numbers = #tpu.dot_dimension_numbers<[1], [0], [0], [1], [0, 0, 1, 1], [], []>} : vector<96x192xf32>, vector<192x128xf32>, vector<96x128xf32> -> vector<96x128xf32>
    %c0_7 = arith.constant 0 : index
    %c0_8 = arith.constant 0 : index
    %7 = vector.load %arg4[%c0_7, %c0_8] : memref<96x1xf32, #tpu.memory_space<vmem>>, vector<96x1xf32>
    %8 = vector.broadcast %7 : vector<96x1xf32> to vector<96x128xf32>
    %9 = arith.addf %6, %8 : vector<96x128xf32>
    %cst_9 = arith.constant 0.000000e+00 : f32
    %10 = vector.broadcast %cst_9 : f32 to vector<96x128xf32>
    %11 = arith.maximumf %9, %10 : vector<96x128xf32>
    %c0_10 = arith.constant 0 : index
    %c0_11 = arith.constant 0 : index
    %12 = vector.load %arg5[%c0_10, %c0_11] : memref<96x1xf32, #tpu.memory_space<vmem>>, vector<96x1xf32>
    %13 = vector.broadcast %12 : vector<96x1xf32> to vector<96x128xf32>
    %14 = arith.mulf %11, %13 : vector<96x128xf32>
    %cst_12 = arith.constant dense<0.000000e+00> : vector<128xf32>
    %15 = vector.multi_reduction <add>, %14, %cst_12 [0] : vector<96x128xf32> to vector<128xf32>
    %16 = vector.shape_cast %15 : vector<128xf32> to vector<1x128xf32>
    %c0_13 = arith.constant 0 : index
    %c0_14 = arith.constant 0 : index
    %17 = vector.load %arg6[%c0_13, %c0_14] : memref<1x1xf32, #tpu.memory_space<vmem>>, vector<1x1xf32>
    %18 = vector.broadcast %17 : vector<1x1xf32> to vector<1x128xf32>
    %19 = arith.addf %16, %18 : vector<1x128xf32>
    %c0_15 = arith.constant 0 : index
    %c0_16 = arith.constant 0 : index
    %20 = vector.load %arg7[%c0_15, %c0_16] : memref<1x128xf32, #tpu.memory_space<vmem>>, vector<1x128xf32>
    tpu.vector_store %arg7[%c0_15, %c0_16], %19 {strides = array<i32>} : memref<1x128xf32, #tpu.memory_space<vmem>>, vector<1x128xf32>,
    return
  }
  func.func @transform_0(%arg0: i32) -> (i32, i32) {
    %c0_i32 = arith.constant 0 : i32
    %c0_i32_0 = arith.constant 0 : i32
    return %c0_i32, %arg0 : i32, i32
  }
  func.func @transform_1(%arg0: i32) -> (i32, i32) {
    %c0_i32 = arith.constant 0 : i32
    %c0_i32_0 = arith.constant 0 : i32
    %c0_i32_1 = arith.constant 0 : i32
    return %c0_i32, %c0_i32_0 : i32, i32
  }
  func.func @transform_2(%arg0: i32) -> (i32, i32) {
    %c0_i32 = arith.constant 0 : i32
    %c0_i32_0 = arith.constant 0 : i32
    %c0_i32_1 = arith.constant 0 : i32
    return %c0_i32, %c0_i32_0 : i32, i32
  }
  func.func @transform_3(%arg0: i32) -> (i32, i32) {
    %c0_i32 = arith.constant 0 : i32
    %c0_i32_0 = arith.constant 0 : i32
    %c0_i32_1 = arith.constant 0 : i32
    return %c0_i32, %c0_i32_0 : i32, i32
  }
  func.func @transform_4(%arg0: i32) -> (i32, i32) {
    %c0_i32 = arith.constant 0 : i32
    %c0_i32_0 = arith.constant 0 : i32
    %c0_i32_1 = arith.constant 0 : i32
    return %c0_i32, %c0_i32_0 : i32, i32
  }
  func.func @transform_5(%arg0: i32) -> (i32, i32) {
    %c0_i32 = arith.constant 0 : i32
    %c0_i32_0 = arith.constant 0 : i32
    %c0_i32_1 = arith.constant 0 : i32
    return %c0_i32, %c0_i32_0 : i32, i32
  }
  func.func @transform_6(%arg0: i32) -> (i32, i32) {
    %c0_i32 = arith.constant 0 : i32
    %c0_i32_0 = arith.constant 0 : i32
    return %c0_i32, %arg0 : i32, i32
  }
}

</mosaic_0001>

<bundles_post_ra>
// kernel: tpu_custom_call.1
= control target key start
LH: loop header
LB: loop body
LE: loop exit
PB: predicated region body
PF: predicated region fallthrough
CT: control target
= control target key end

     0   :  { %s1281_s0 = inlined_call_operand.vmem [shape: f32[8,128], index: 0, kind: input, shape index: {}]   ;;  %s1282_s1 = inlined_call_operand.vmem [shape: f32[192,8], index: 1, kind: input, shape index: {}]   ;;  %s1283_s2 = inlined_call_operand.vmem [shape: f32[96,192], index: 2, kind: input, shape index: {}]   ;;  %s1284_s3 = inlined_call_operand.vmem [shape: f32[96,1], index: 3, kind: input, shape index: {}]   ;;  %s1285_s4 = inlined_call_operand.vmem [shape: f32[96,1], index: 4, kind: input, shape index: {}]   ;;  %s1286_s5 = inlined_call_operand.<no memory space> [shape: f32[1,1], index: 5, kind: input, shape index: {}]   ;;  %s1287_s6 = inlined_call_operand.hbm [shape: f32[1,128], index: 6, kind: output, shape index: {}]  }
   0x1   :  { %v11_v0 = vstv %s1286_s5 }
   0x2   :  { %12 = vst [vmem:[#allocation2] sm:$0x1] %v11_v0 }
   0x3   :  { %v26_v1 = vld [vmem:[%s1281_s0] sm:$0xff]  ;;  %vm51_vm0 = vcmask 64512   ;;  %v28_v3 = vld [vmem:[%s1282_s1 + $0x8] sm:$0xff]  ;;  %v29_v4 = vld [vmem:[%s1282_s1 + $0x10] sm:$0xff] }
   0x4   :  { %v27_v2 = vld [vmem:[%s1282_s1] sm:$0xff]  ;;  %791 = vmatprep.subr.mxu0 %v26_v1  ;;  %v30_v5 = vld [vmem:[%s1282_s1 + $0x18] sm:$0xff]  ;;  %v32_v7 = vld [vmem:[%s1282_s1 + $0x28] sm:$0xff] }
   0x5   :  { %793 = vmatprep.mubr.msk.f32.mxu0 %vm51_vm0, %v27_v2  ;;  %792 = vmatpush3.msra.mxu0 %v26_v1  ;;  %v31_v6 = vld [vmem:[%s1282_s1 + $0x20] sm:$0xff] }
   0x6   :  { %794 = vmatmul.mubr.msk.f32.vlgmr.msra.gmra.mxu0 %vm51_vm0, %v28_v3 }
   0x7   :  { %796 = vmatprep.mubr.msk.f32.mxu0 %vm51_vm0, %v29_v4 }
   0xa   :  { %797 = vmatmul.mubr.msk.f32.gmra.mxu0 %vm51_vm0, %v30_v5 }
   0xb   :  { %799 = vmatprep.mubr.msk.f32.mxu0 %vm51_vm0, %v31_v6 }
   0xc   :  { %13 = vsyncpa [#allocation4], 0  ;;  %v33_v8 = vld [vmem:[%s1282_s1 + $0x30] sm:$0xff]  ;;  %v34_v9 = vld [vmem:[%s1282_s1 + $0x38] sm:$0xff]  ;;  %v904_v26 = vmov 0.0   ;;  %vm429_vm1 = vcmask 523264  }
   0xd   :  { %v35_v10 = vld [vmem:[%s1282_s1 + $0x40] sm:$0xff]  ;;  %v36_v11 = vld [vmem:[%s1282_s1 + $0x48] sm:$0xff]  ;;  %v37_v12 = vld [vmem:[%s1282_s1 + $0x50] sm:$0xff]  ;;  %466 = vmatprep.subr.mxu0 %v904_v26  ;;  %829 = vmatprep.subr.mxu1 %v904_v26  ;;  %v905_v29 = vmov 0  }
   0xe   :  { %800 = vmatmul.mubr.msk.f32.gmra.mxu0 %vm51_vm0, %v32_v7  ;;  %v38_v13 = vld [vmem:[%s1282_s1 + $0x58] sm:$0xff]  ;;  %v39_v14 = vld [vmem:[%s1282_s1 + $0x60] sm:$0xff]  ;;  %v40_v15 = vld [vmem:[%s1282_s1 + $0x68] sm:$0xff]  ;;  %880 = vset.pattern.permute.xlu0 %v905_v29 }
   0xf   :  { %802 = vmatprep.mubr.msk.f32.mxu0 %vm51_vm0, %v33_v8  ;;  %v41_v16 = vld [vmem:[%s1282_s1 + $0x70] sm:$0xff]  ;;  %v42_v17 = vld [vmem:[%s1282_s1 + $0x78] sm:$0xff]  ;;  %v43_v18 = vld [vmem:[%s1282_s1 + $0x80] sm:$0xff]  ;;  %881 = vset.pattern.permute.xlu1 %v905_v29 }
  0x10   :  { %v44_v19 = vld [vmem:[%s1282_s1 + $0x88] sm:$0xff]  ;;  %v45_v20 = vld [vmem:[%s1282_s1 + $0x90] sm:$0xff]  ;;  %v46_v21 = vld [vmem:[%s1282_s1 + $0x98] sm:$0xff] }
  0x11   :  { %v47_v22 = vld [vmem:[%s1282_s1 + $0xa0] sm:$0xff]  ;;  %v48_v23 = vld [vmem:[%s1282_s1 + $0xa8] sm:$0xff]  ;;  %v49_v24 = vld [vmem:[%s1282_s1 + $0xb0] sm:$0xff] }
  0x12   :  { %803 = vmatmul.mubr.msk.f32.gmra.mxu0 %vm51_vm0, %v34_v9  ;;  %v50_v25 = vld [vmem:[%s1282_s1 + $0xb8] sm:$0xff]  ;;  %v334_v27 = vld [vmem:[%s1283_s2 + $0x8] sm:$0xff]  ;;  %v357_v30 = vld [vmem:[%s1284_s3] sm:$0xff] }
  0x13   :  { %805 = vmatprep.mubr.msk.f32.mxu0 %vm51_vm0, %v35_v10  ;;  %v344_v28 = vld [vmem:[%s1283_s2 + $0x58] sm:$0xff]  ;;  %371 = vperm.xlu0 %880, %v357_v30   ;;  %v358_v31 = vld [vmem:[%s1284_s3 + $0x8] sm:$0xff]  ;;  %v359_v32 = vld [vmem:[%s1284_s3 + $0x10] sm:$0xff] }
  0x14   :  { %759 = vmatprep.mubr.msk.f32.mxu1 %vm429_vm1, %v344_v28  ;;  %381 = vperm.xlu1 %881, %v359_v32   ;;  %v603_v33 = vld [vmem:[%s1285_s4] sm:$0xff]  ;;  %v360_v34 = vld [vmem:[%s1284_s3 + $0x18] sm:$0xff]  ;;  %v604_v36 = vld [vmem:[%s1285_s4 + $0x8] sm:$0xff] }
  0x15   :  { %v361_v35 = vld [vmem:[%s1284_s3 + $0x20] sm:$0xff]  ;;  %v362_v37 = vld [vmem:[%s1284_s3 + $0x28] sm:$0xff]  ;;  %v605_v38 = vld [vmem:[%s1285_s4 + $0x10] sm:$0xff] }
  0x16   :  { %806 = vmatmul.mubr.msk.f32.gmra.mxu0 %vm51_vm0, %v36_v11  ;;  %v363_v39 = vld [vmem:[%s1284_s3 + $0x30] sm:$0xff]  ;;  %v606_v40 = vld [vmem:[%s1285_s4 + $0x18] sm:$0xff]  ;;  %v607_v42 = vld [vmem:[%s1285_s4 + $0x20] sm:$0xff] }
  0x17   :  { %808 = vmatprep.mubr.msk.f32.mxu0 %vm51_vm0, %v37_v12  ;;  %376 = vperm.xlu0 %880, %v358_v31   ;;  %v364_v41 = vld [vmem:[%s1284_s3 + $0x38] sm:$0xff]  ;;  %v365_v43 = vld [vmem:[%s1284_s3 + $0x40] sm:$0xff]  ;;  %v608_v44 = vld [vmem:[%s1285_s4 + $0x28] sm:$0xff] }
  0x18   :  { %386 = vperm.xlu1 %881, %v360_v34   ;;  %v366_v45 = vld [vmem:[%s1284_s3 + $0x48] sm:$0xff]  ;;  %v609_v46 = vld [vmem:[%s1285_s4 + $0x30] sm:$0xff]  ;;  %v610_v48 = vld [vmem:[%s1285_s4 + $0x38] sm:$0xff] }
  0x19   :  { %v367_v47 = vld [vmem:[%s1284_s3 + $0x50] sm:$0xff]  ;;  %v368_v49 = vld [vmem:[%s1284_s3 + $0x58] sm:$0xff]  ;;  %v611_v50 = vld [vmem:[%s1285_s4 + $0x40] sm:$0xff] }
  0x1a   :  { %809 = vmatmul.mubr.msk.f32.gmra.mxu0 %vm51_vm0, %v38_v13  ;;  %v613_v52 = vld [vmem:[%s1285_s4 + $0x50] sm:$0xff]  ;;  %v612_v53 = vld [vmem:[%s1285_s4 + $0x48] sm:$0xff]  ;;  %v704_v56 = vld [vmem:[#allocation2] sm:$0x1] }
  0x1b   :  { %811 = vmatprep.mubr.msk.f32.mxu0 %vm51_vm0, %v39_v14  ;;  %617 = vperm.xlu0 %880, %v603_v33   ;;  %v614_v57 = vld [vmem:[%s1285_s4 + $0x58] sm:$0xff] }
  0x1c   :  { %622 = vperm.xlu1 %881, %v604_v36  }
  0x1e   :  { %812 = vmatmul.mubr.msk.f32.gmra.mxu0 %vm51_vm0, %v40_v15 }
  0x1f   :  { %814 = vmatprep.mubr.msk.f32.mxu0 %vm51_vm0, %v41_v16  ;;  %391 = vperm.xlu0 %880, %v361_v35  }
  0x20   :  { %627 = vperm.xlu1 %881, %v605_v38  }
  0x22   :  { %815 = vmatmul.mubr.msk.f32.gmra.mxu0 %vm51_vm0, %v42_v17 }
  0x23   :  { %817 = vmatprep.mubr.msk.f32.mxu0 %vm51_vm0, %v43_v18  ;;  %396 = vperm.xlu0 %880, %v362_v37  }
  0x24   :  { %632 = vperm.xlu1 %881, %v606_v40   ;;  %v333_v40 = vld [vmem:[%s1283_s2] sm:$0xff] }
  0x26   :  { %818 = vmatmul.mubr.msk.f32.gmra.mxu0 %vm51_vm0, %v44_v19 }
  0x27   :  { %820 = vmatprep.mubr.msk.f32.mxu0 %vm51_vm0, %v45_v20  ;;  %401 = vperm.xlu0 %880, %v363_v39  }
  0x28   :  { %637 = vperm.xlu1 %881, %v607_v42   ;;  %v336_v42 = vld [vmem:[%s1283_s2 + $0x18] sm:$0xff] }
  0x2a   :  { %821 = vmatmul.mubr.msk.f32.gmra.mxu0 %vm51_vm0, %v46_v21 }
  0x2b   :  { %823 = vmatprep.mubr.msk.f32.mxu0 %vm51_vm0, %v47_v22  ;;  %406 = vperm.xlu0 %880, %v364_v41   ;;  %v343_v41 = vld [vmem:[%s1283_s2 + $0x50] sm:$0xff] }
  0x2c   :  { %642 = vperm.xlu1 %881, %v608_v44   ;;  %v345_v44 = vld [vmem:[%s1283_s2 + $0x60] sm:$0xff] }
  0x2e   :  { %824 = vmatmul.mubr.msk.f32.gmra.mxu0 %vm51_vm0, %v48_v23 }
  0x2f   :  { %826 = vmatprep.mubr.msk.f32.mxu0 %vm51_vm0, %v49_v24  ;;  %411 = vperm.xlu0 %880, %v365_v43   ;;  %v346_v43 = vld [vmem:[%s1283_s2 + $0x68] sm:$0xff] }
  0x30   :  { %647 = vperm.xlu1 %881, %v609_v46   ;;  %v348_v46 = vld [vmem:[%s1283_s2 + $0x78] sm:$0xff] }
  0x32   :  { %827 = vmatmul.mubr.msk.f32.gmra.mxu0 %vm51_vm0, %v50_v25 }
  0x33   :  { %754 = vmatprep.mubr.msk.f32.mxu0 %vm429_vm1, %v334_v27  ;;  %416 = vperm.xlu0 %880, %v366_v45   ;;  %v338_v45 = vld [vmem:[%s1283_s2 + $0x28] sm:$0xff] }
  0x34   :  { %652 = vperm.xlu1 %881, %v610_v48   ;;  %v347_v48 = vld [vmem:[%s1283_s2 + $0x70] sm:$0xff] }
  0x37   :  { %421 = vperm.xlu0 %880, %v367_v47   ;;  %v337_v47 = vld [vmem:[%s1283_s2 + $0x20] sm:$0xff] }
  0x38   :  { %657 = vperm.xlu1 %881, %v611_v50   ;;  %v350_v50 = vld [vmem:[%s1283_s2 + $0x88] sm:$0xff] }
  0x3b   :  { %426 = vperm.xlu0 %880, %v368_v49   ;;  %v340_v49 = vld [vmem:[%s1283_s2 + $0x38] sm:$0xff] }
  0x3c   :  { %662 = vperm.xlu1 %881, %v612_v53   ;;  %v342_v53 = vld [vmem:[%s1283_s2 + $0x48] sm:$0xff] }
  0x3f   :  { %667 = vperm.xlu0 %880, %v613_v52   ;;  %v349_v52 = vld [vmem:[%s1283_s2 + $0x80] sm:$0xff] }
  0x40   :  { %672 = vperm.xlu1 %881, %v614_v57   ;;  %v354_v57 = vld [vmem:[%s1283_s2 + $0xa8] sm:$0xff] }
  0x43   :  { %707 = vperm.xlu0 %880, %v704_v56   ;;  %v351_v56 = vld [vmem:[%s1283_s2 + $0x90] sm:$0xff] }
  0xc6   :  { %v1117_v51 = vpop.f32.mrf.mxu0 }
  0xc7   :  { %v310_v29 = vmax.f32 %v1117_v51, 0.0  ;;  %v339_v51 = vld [vmem:[%s1283_s2 + $0x30] sm:$0xff] }
  0xc8   :  { %v1125_v54 = vpop.f32.mrf.mxu0 }
  0xc9   :  { %v309_v30 = vmax.f32 %v1125_v54, 0.0  ;;  %v352_v54 = vld [vmem:[%s1283_s2 + $0x98] sm:$0xff] }
  0xca   :  { %v1127_v55 = vpop.f32.mrf.mxu0 }
  0xcb   :  { %v312_v25 = vmax.f32 %v1127_v55, 0.0  ;;  %v341_v55 = vld [vmem:[%s1283_s2 + $0x40] sm:$0xff] }
  0xcc   :  { %v1132_v58 = vpop.f32.mrf.mxu0 }
  0xcd   :  { %v311_v27 = vmax.f32 %v1132_v58, 0.0  ;;  %v353_v58 = vld [vmem:[%s1283_s2 + $0xa0] sm:$0xff] }
  0xce   :  { %v1134_v59 = vpop.f32.mrf.mxu0 }
  0xcf   :  { %v314_v22 = vmax.f32 %v1134_v59, 0.0  ;;  %v356_v59 = vld [vmem:[%s1283_s2 + $0xb8] sm:$0xff] }
  0xd0   :  { %v1136_v60 = vpop.f32.mrf.mxu0 }
  0xd1   :  { %v313_v23 = vmax.f32 %v1136_v60, 0.0  ;;  %v355_v60 = vld [vmem:[%s1283_s2 + $0xb0] sm:$0xff] }
  0xd2   :  { %v804_v61 = vpop.f32.mrf.mxu0 }
  0xd3   :  { %v316_v19 = vmax.f32 %v804_v61, 0.0  ;;  %v372_v61 = vpop.permute.xlu0 %371 }
  0xd4   :  { %v220_v62 = vpop.f32.mrf.mxu0 }
  0xd5   :  { %v315_v20 = vmax.f32 %v220_v62, 0.0  ;;  %v382_v62 = vpop.permute.xlu1 %381 }
  0xd6   :  { %v807_v63 = vpop.f32.mrf.mxu0 }
  0xd7   :  { %v318_v16 = vmax.f32 %v807_v63, 0.0  ;;  %v377_v63 = vpop.permute.xlu0 %376 }
  0xd8   :  { %v230_v0 = vpop.f32.mrf.mxu0 }
  0xd9   :  { %v317_v17 = vmax.f32 %v230_v0, 0.0  ;;  %v387_v0 = vpop.permute.xlu1 %386 }
  0xda   :  { %v810_v1 = vpop.f32.mrf.mxu0 }
  0xdb   :  { %v320_v13 = vmax.f32 %v810_v1, 0.0  ;;  %v618_v1 = vpop.permute.xlu0 %617 }
  0xdc   :  { %v240_v2 = vpop.f32.mrf.mxu0 }
  0xdd   :  { %v319_v14 = vmax.f32 %v240_v2, 0.0  ;;  %v623_v2 = vpop.permute.xlu1 %622 }
  0xde   :  { %v813_v3 = vpop.f32.mrf.mxu0 }
  0xdf   :  { %v322_v10 = vmax.f32 %v813_v3, 0.0  ;;  %v392_v3 = vpop.permute.xlu0 %391 }
  0xe0   :  { %v250_v4 = vpop.f32.mrf.mxu0 }
  0xe1   :  { %v321_v11 = vmax.f32 %v250_v4, 0.0  ;;  %v628_v4 = vpop.permute.xlu1 %627 }
  0xe2   :  { %v816_v5 = vpop.f32.mrf.mxu0 }
  0xe3   :  { %v324_v6 = vmax.f32 %v816_v5, 0.0  ;;  %v397_v5 = vpop.permute.xlu0 %396 }
  0xe4   :  { %v260_v7 = vpop.f32.mrf.mxu0 }
  0xe5   :  { %v323_v8 = vmax.f32 %v260_v7, 0.0  ;;  %467 = vmatpush1.msra.mxu0 %v324_v6  ;;  %853 = vmatpush1.msra.mxu1 %v324_v6  ;;  %v633_v6 = vpop.permute.xlu1 %632 }
  0xe6   :  { %468 = vmatprep.subr.mxu0 %v904_v26  ;;  %830 = vmatprep.subr.mxu1 %v904_v26  ;;  %v1140_v9 = vpop.f32.mrf.mxu0 }
  0xe7   :  { %469 = vmatpush1.msra.mxu0 %v323_v8  ;;  %854 = vmatpush1.msra.mxu1 %v323_v8  ;;  %v326_v38 = vmax.f32 %v1140_v9, 0.0  ;;  %v402_v7 = vpop.permute.xlu0 %401 }
  0xe8   :  { %470 = vmatprep.subr.mxu0 %v904_v26  ;;  %831 = vmatprep.subr.mxu1 %v904_v26  ;;  %v1146_v12 = vpop.f32.mrf.mxu0 }
  0xe9   :  { %471 = vmatpush1.msra.mxu0 %v322_v10  ;;  %855 = vmatpush1.msra.mxu1 %v322_v10  ;;  %v325_v39 = vmax.f32 %v1146_v12, 0.0  ;;  %v638_v8 = vpop.permute.xlu1 %637 }
  0xea   :  { %472 = vmatprep.subr.mxu0 %v904_v26  ;;  %832 = vmatprep.subr.mxu1 %v904_v26  ;;  %v1152_v15 = vpop.f32.mrf.mxu0 }
  0xeb   :  { %473 = vmatpush1.msra.mxu0 %v321_v11  ;;  %856 = vmatpush1.msra.mxu1 %v321_v11  ;;  %v328_v36 = vmax.f32 %v1152_v15, 0.0  ;;  %v407_v11 = vpop.permute.xlu0 %406 }
  0xec   :  { %474 = vmatprep.subr.mxu0 %v904_v26  ;;  %833 = vmatprep.subr.mxu1 %v904_v26  ;;  %v1158_v18 = vpop.f32.mrf.mxu0 }
  0xed   :  { %475 = vmatpush1.msra.mxu0 %v320_v13  ;;  %857 = vmatpush1.msra.mxu1 %v320_v13  ;;  %v327_v37 = vmax.f32 %v1158_v18, 0.0 }
  0xee   :  { %476 = vmatprep.subr.mxu0 %v904_v26  ;;  %834 = vmatprep.subr.mxu1 %v904_v26  ;;  %v825_v21 = vpop.f32.mrf.mxu0 }
  0xef   :  { %477 = vmatpush1.msra.mxu0 %v319_v14  ;;  %858 = vmatpush1.msra.mxu1 %v319_v14  ;;  %v330_v34 = vmax.f32 %v825_v21, 0.0  ;;  %v643_v14 = vpop.permute.xlu1 %642 }
  0xf0   :  { %478 = vmatprep.subr.mxu0 %v904_v26  ;;  %835 = vmatprep.subr.mxu1 %v904_v26  ;;  %v290_v24 = vpop.f32.mrf.mxu0 }
  0xf1   :  { %479 = vmatpush1.msra.mxu0 %v318_v16  ;;  %859 = vmatpush1.msra.mxu1 %v318_v16  ;;  %v329_v35 = vmax.f32 %v290_v24, 0.0 }
  0xf2   :  { %480 = vmatprep.subr.mxu0 %v904_v26  ;;  %836 = vmatprep.subr.mxu1 %v904_v26  ;;  %v828_v28 = vpop.f32.mrf.mxu0 }
  0xf3   :  { %481 = vmatpush1.msra.mxu0 %v317_v17  ;;  %860 = vmatpush1.msra.mxu1 %v317_v17  ;;  %v332_v31 = vmax.f32 %v828_v28, 0.0  ;;  %v648_v24 = vpop.permute.xlu1 %647 }
  0xf4   :  { %482 = vmatprep.subr.mxu0 %v904_v26  ;;  %837 = vmatprep.subr.mxu1 %v904_v26  ;;  %v300_v32 = vpop.f32.mrf.mxu0 }
  0xf5   :  { %483 = vmatpush1.msra.mxu0 %v316_v19  ;;  %861 = vmatpush1.msra.mxu1 %v316_v19  ;;  %v331_v33 = vmax.f32 %v300_v32, 0.0 }
  0xf6   :  { %484 = vmatprep.subr.mxu0 %v904_v26  ;;  %838 = vmatprep.subr.mxu1 %v904_v26 }
  0xf7   :  { %485 = vmatpush1.msra.mxu0 %v315_v20  ;;  %862 = vmatpush1.msra.mxu1 %v315_v20  ;;  %v412_v20 = vpop.permute.xlu0 %411 }
  0xf8   :  { %486 = vmatprep.subr.mxu0 %v904_v26  ;;  %839 = vmatprep.subr.mxu1 %v904_v26 }
  0xf9   :  { %487 = vmatpush1.msra.mxu0 %v314_v22  ;;  %863 = vmatpush1.msra.mxu1 %v314_v22 }
  0xfa   :  { %488 = vmatprep.subr.mxu0 %v904_v26  ;;  %840 = vmatprep.subr.mxu1 %v904_v26 }
  0xfb   :  { %489 = vmatpush1.msra.mxu0 %v313_v23  ;;  %864 = vmatpush1.msra.mxu1 %v313_v23 }
  0xfc   :  { %490 = vmatprep.subr.mxu0 %v904_v26  ;;  %841 = vmatprep.subr.mxu1 %v904_v26 }
  0xfd   :  { %491 = vmatpush1.msra.mxu0 %v312_v25  ;;  %865 = vmatpush1.msra.mxu1 %v312_v25 }
  0xfe   :  { %492 = vmatprep.subr.mxu0 %v904_v26  ;;  %842 = vmatprep.subr.mxu1 %v904_v26 }
  0xff   :  { %493 = vmatpush1.msra.mxu0 %v311_v27  ;;  %866 = vmatpush1.msra.mxu1 %v311_v27 }
 0x100   :  { %494 = vmatprep.subr.mxu0 %v904_v26  ;;  %843 = vmatprep.subr.mxu1 %v904_v26 }
 0x101   :  { %495 = vmatpush1.msra.mxu0 %v310_v29  ;;  %867 = vmatpush1.msra.mxu1 %v310_v29 }
 0x102   :  { %496 = vmatprep.subr.mxu0 %v904_v26  ;;  %844 = vmatprep.subr.mxu1 %v904_v26 }
 0x103   :  { %497 = vmatpush1.msra.mxu0 %v309_v30  ;;  %868 = vmatpush1.msra.mxu1 %v309_v30 }
 0x104   :  { %514 = vmatprep.subr.mxu0 %v904_v26  ;;  %845 = vmatprep.subr.mxu1 %v904_v26 }
 0x105   :  { %515 = vmatpush2.msra.mxu0 %v332_v31  ;;  %869 = vmatpush2.msra.mxu1 %v332_v31 }
 0x106   :  { %516 = vmatprep.subr.mxu0 %v904_v26  ;;  %846 = vmatprep.subr.mxu1 %v904_v26 }
 0x107   :  { %517 = vmatpush2.msra.mxu0 %v331_v33  ;;  %870 = vmatpush2.msra.mxu1 %v331_v33 }
 0x108   :  { %518 = vmatprep.subr.mxu0 %v904_v26  ;;  %847 = vmatprep.subr.mxu1 %v904_v26 }
 0x109   :  { %519 = vmatpush2.msra.mxu0 %v330_v34  ;;  %871 = vmatpush2.msra.mxu1 %v330_v34  ;;  %v417_v34 = vpop.permute.xlu0 %416 }
 0x10a   :  { %520 = vmatprep.subr.mxu0 %v904_v26  ;;  %848 = vmatprep.subr.mxu1 %v904_v26 }
 0x10b   :  { %521 = vmatpush2.msra.mxu0 %v329_v35  ;;  %872 = vmatpush2.msra.mxu1 %v329_v35 }
 0x10c   :  { %522 = vmatprep.subr.mxu0 %v904_v26  ;;  %849 = vmatprep.subr.mxu1 %v904_v26 }
 0x10d   :  { %523 = vmatpush2.msra.mxu0 %v328_v36  ;;  %873 = vmatpush2.msra.mxu1 %v328_v36 }
 0x10e   :  { %524 = vmatprep.subr.mxu0 %v904_v26  ;;  %850 = vmatprep.subr.mxu1 %v904_v26 }
 0x10f   :  { %525 = vmatpush2.msra.mxu0 %v327_v37  ;;  %874 = vmatpush2.msra.mxu1 %v327_v37 }
 0x110   :  { %526 = vmatprep.subr.mxu0 %v904_v26  ;;  %851 = vmatprep.subr.mxu1 %v904_v26 }
 0x111   :  { %527 = vmatpush2.msra.mxu0 %v326_v38  ;;  %875 = vmatpush2.msra.mxu1 %v326_v38 }
 0x112   :  { %528 = vmatprep.subr.mxu0 %v904_v26  ;;  %852 = vmatprep.subr.mxu1 %v904_v26  ;;  %v335_v26 = vld [vmem:[%s1283_s2 + $0x10] sm:$0xff]  ;;  %s906_s2 = smov [#allocation3]  }
 0x113   :  { %529 = vmatpush2.msra.mxu0 %v325_v39  ;;  %876 = vmatpush2.msra.mxu1 %v325_v39  ;;  %v653_v39 = vpop.permute.xlu1 %652  ;;  %s722_s0 = sshll.u32 %s906_s2, 4  ;;  %s723_s0 = int_to_ptr.vmem [resolvable:$true] %s722_s0 }
 0x114   :  { %531 = vmatmul.mubr.f32.vlgmr.msra.gmra.mxu0 %v333_v40  ;;  %556 = vmatmul.mubr.f32.vlgmr.msra.gmra.mxu1 %v343_v41  ;;  %s882_s5 = scalar_lea.vmem %s723_s0, 16  ;;  %s886_s7 = scalar_lea.vmem %s723_s0, 32 }
 0x115   :  { %755 = vmatprep.mubr.msk.f32.mxu0 %vm429_vm1, %v336_v42  ;;  %760 = vmatprep.mubr.msk.f32.mxu1 %vm429_vm1, %v346_v43  ;;  %p883_p0 = scmp.ne.s32.totalorder %s723_s0, %s882_s5  ;;  %p887_p1 = scmp.lt.s32.totalorder %s723_s0, %s723_s0 }
 0x116   :  { %p888_p2 = scmp.lt.s32.totalorder %s886_s7, %s882_s5 }
 0x118   :  { %536 = vmatmul.mubr.f32.gmra.mxu0 %v335_v26  ;;  %561 = vmatmul.mubr.f32.gmra.mxu1 %v345_v44  ;;  %p889_p3 = por %p888_p2, %p887_p1 }
 0x119   :  { %756 = vmatprep.mubr.msk.f32.mxu0 %vm429_vm1, %v338_v45  ;;  %761 = vmatprep.mubr.msk.f32.mxu1 %vm429_vm1, %v348_v46 }
 0x11a   :  { %p890_p4 = pnand %p889_p3, %p883_p0 }
 0x11c   :  { %541 = vmatmul.mubr.f32.gmra.mxu0 %v337_v47  ;;  %566 = vmatmul.mubr.f32.gmra.mxu1 %v347_v48 }
 0x11d   :  { %757 = vmatprep.mubr.msk.f32.mxu0 %vm429_vm1, %v340_v49  ;;  %762 = vmatprep.mubr.msk.f32.mxu1 %vm429_vm1, %v350_v50 }
 0x120   :  { %546 = vmatmul.mubr.f32.gmra.mxu0 %v339_v51  ;;  %571 = vmatmul.mubr.f32.gmra.mxu1 %v349_v52 }
 0x121   :  { %758 = vmatprep.mubr.msk.f32.mxu0 %vm429_vm1, %v342_v53  ;;  %763 = vmatprep.mubr.msk.f32.mxu1 %vm429_vm1, %v352_v54 }
 0x124   :  { %551 = vmatmul.mubr.f32.gmra.mxu0 %v341_v55  ;;  %576 = vmatmul.mubr.f32.gmra.mxu1 %v351_v56  ;;  %v422_v55 = vpop.permute.xlu0 %421 }
 0x125   :  { %764 = vmatprep.mubr.msk.f32.mxu1 %vm429_vm1, %v354_v57 }
 0x128   :  { %581 = vmatmul.mubr.f32.gmra.mxu1 %v353_v58 }
 0x129   :  { %765 = vmatprep.mubr.msk.f32.mxu1 %vm429_vm1, %v356_v59 }
 0x12c   :  { %586 = vmatmul.mubr.f32.gmra.mxu1 %v355_v60 }
 0x1d4   :  { %v532_v9 = vpop.f32.mrf.mxu0  ;;  %v557_v10 = vpop.f32.mrf.mxu1 }
 0x1d5   :  { %v533_v21 = vadd.f32 %v532_v9, %v372_v61  ;;  %v558_v41 = vadd.f32 %v557_v10, %v397_v5  ;;  %v658_v61 = vpop.permute.xlu1 %657  ;;  %v427_v9 = vpop.permute.xlu0 %426 }
 0x1d6   :  { %v534_v12 = vpop.f32.mrf.mxu0  ;;  %v559_v13 = vpop.f32.mrf.mxu1 }
 0x1d7   :  { %v591_v30 = vmax.f32 %v533_v21, 0.0  ;;  %v596_v51 = vmax.f32 %v558_v41, 0.0 }
 0x1d8   :  { %v537_v15 = vpop.f32.mrf.mxu0  ;;  %v562_v16 = vpop.f32.mrf.mxu1 }
 0x1d9   :  { %v538_v17 = vadd.f32 %v537_v15, %v377_v63  ;;  %v675_v40 = vmul.f32 %v618_v1, %v591_v30  ;;  %v563_v46 = vadd.f32 %v562_v16, %v402_v7  ;;  %v680_v63 = vmul.f32 %v643_v14, %v596_v51  ;;  %v663_v16 = vpop.permute.xlu1 %662  ;;  %v668_v21 = vpop.permute.xlu0 %667 }
 0x1da   :  { %v539_v18 = vpop.f32.mrf.mxu0  ;;  %v564_v19 = vpop.f32.mrf.mxu1 }
 0x1db   :  { %v592_v25 = vmax.f32 %v538_v17, 0.0  ;;  %v597_v57 = vmax.f32 %v563_v46, 0.0 }
 0x1dc   :  { %v542_v22 = vpop.f32.mrf.mxu0  ;;  %v567_v23 = vpop.f32.mrf.mxu1 }
 0x1dd   :  { %v543_v27 = vadd.f32 %v542_v22, %v382_v62  ;;  %v676_v35 = vmul.f32 %v623_v2, %v592_v25  ;;  %v568_v53 = vadd.f32 %v567_v23, %v407_v11 }
 0x1de   :  { %v544_v28 = vpop.f32.mrf.mxu0  ;;  %v569_v29 = vpop.f32.mrf.mxu1 }
 0x1df   :  { %v593_v31 = vmax.f32 %v543_v27, 0.0  ;;  %v687_v45 = vadd.f32 %v676_v35, %v675_v40  ;;  %v710_v28 = vlaneseq }
 0x1e0   :  { %v547_v32 = vpop.f32.mrf.mxu0  ;;  %v572_v33 = vpop.f32.mrf.mxu1 }
 0x1e1   :  { %v548_v36 = vadd.f32 %v547_v32, %v387_v0  ;;  %v677_v42 = vmul.f32 %v628_v4, %v593_v31  ;;  %v573_v59 = vadd.f32 %v572_v33, %v412_v20  ;;  %v598_v0 = vmax.f32 %v568_v53, 0.0 }
 0x1e2   :  { %v549_v37 = vpop.f32.mrf.mxu0  ;;  %v574_v38 = vpop.f32.mrf.mxu1  ;;  %v711_v31 = vshrl.u32 %v710_v28, 7 }
 0x1e3   :  { %v594_v43 = vmax.f32 %v548_v36, 0.0  ;;  %v688_v52 = vadd.f32 %v687_v45, %v677_v42  ;;  %v599_v5 = vmax.f32 %v573_v59, 0.0  ;;  %v682_v11 = vmul.f32 %v653_v39, %v598_v0  ;;  %v708_v36 = vpop.permute.xlu0 %707 }
 0x1e4   :  { %v552_v26 = vpop.f32.mrf.mxu0  ;;  %v577_v44 = vpop.f32.mrf.mxu1 }
 0x1e5   :  { %v678_v47 = vmul.f32 %v633_v6, %v594_v43  ;;  %v553_v48 = vadd.f32 %v552_v26, %v392_v3  ;;  %v578_v2 = vadd.f32 %v577_v44, %v417_v34  ;;  %v681_v3 = vmul.f32 %v648_v24, %v597_v57  ;;  %v673_v24 = vpop.permute.xlu1 %672 }
 0x1e6   :  { %v554_v49 = vpop.f32.mrf.mxu0  ;;  %v579_v50 = vpop.f32.mrf.mxu1  ;;  %v683_v17 = vmul.f32 %v658_v61, %v599_v5  ;;  %v712_v34 = vsub.s32 0, %v711_v31 }
 0x1e7   :  { %v595_v54 = vmax.f32 %v553_v48, 0.0  ;;  %v689_v58 = vadd.f32 %v688_v52, %v678_v47  ;;  %v600_v13 = vmax.f32 %v578_v2, 0.0 }
 0x1e8   :  { %v582_v56 = vpop.f32.mrf.mxu1  ;;  %v713_v38 = vrot.slane %v708_v36, %v712_v34 }
 0x1e9   :  { %v679_v60 = vmul.f32 %v638_v8, %v595_v54  ;;  %v583_v7 = vadd.f32 %v582_v56, %v422_v55  ;;  %v684_v19 = vmul.f32 %v663_v16, %v600_v13 }
 0x1ea   :  { %v584_v62 = vpop.f32.mrf.mxu1 }
 0x1eb   :  { %v690_v1 = vadd.f32 %v689_v58, %v679_v60  ;;  %v601_v18 = vmax.f32 %v583_v7, 0.0 }
 0x1ec   :  { %v587_v4 = vpop.f32.mrf.mxu1 }
 0x1ed   :  { %v691_v6 = vadd.f32 %v690_v1, %v680_v63  ;;  %v588_v15 = vadd.f32 %v587_v4, %v427_v9  ;;  %v685_v23 = vmul.f32 %v668_v21, %v601_v18 }
 0x1ee   :  { %v589_v10 = vpop.f32.mrf.mxu1 }
 0x1ef   :  { %v692_v12 = vadd.f32 %v691_v6, %v681_v3  ;;  %v602_v20 = vmax.f32 %v588_v15, 0.0 }
 0x1f1   :  { %v693_v8 = vadd.f32 %v692_v12, %v682_v11  ;;  %v686_v27 = vmul.f32 %v673_v24, %v602_v20 }
 0x1f3   :  { %v694_v14 = vadd.f32 %v693_v8, %v683_v17 }
 0x1f5   :  { %v695_v22 = vadd.f32 %v694_v14, %v684_v19 }
 0x1f7   :  { %v696_v25 = vadd.f32 %v695_v22, %v685_v23 }
 0x1f9   :  { %v697_v29 = vadd.f32 %v696_v25, %v686_v27 }
 0x1fb   :  { %v698_v30 = vrot.slane %v697_v29, 4 }
 0x1fd   :  { %v699_v32 = vadd.f32 %v698_v30, %v697_v29 }
 0x1ff   :  { %v700_v33 = vrot.slane %v699_v32, 2 }
 0x201   :  { %v701_v35 = vadd.f32 %v700_v33, %v699_v32 }
 0x203   :  { %v702_v37 = vrot.slane %v701_v35, 1 }
 0x205   :  { %v703_v39 = vadd.f32 %v702_v37, %v701_v35 }
 0x207   :  { %v714_v40 = vadd.f32 %v713_v38, %v703_v39 }
 0x209   :  { %715 = vst [vmem:[#allocation3] sm:$0x1] %v714_v40 }
 0x20a   :  { %893 = shalt.err (!%p890_p4)
}
 0x20b   :  { %725 = dma.vmem_to_hbm [thread:$0]  %s723_s0, 16, %s1287_s6, [#allocation4]  }
 0x20c   :  { %902 = dma.done.wait [#allocation4], 16  }
 0x20d   :  { %903 = vsyncadd [#allocation4], 4294967280 }
 0x20e   :  { %729 = vsyncpa [#allocation4], 1 }

</bundles_post_ra>
